<compile_context>
chip_gen: v7x
topology: tpu7x:2x2x1
jax: 0.10.0
libtpu: 0.0.40
codegen_flags: <defaults>
</compile_context>

<pallas_src>
import math

import jax
import jax.numpy as jnp
from jax.experimental import pallas as pl
from jax.experimental.pallas import tpu as pltpu


def _make_attn_kernel(has_mask: bool, scale: float):
    """Build the kernel body; `has_mask` selects the input signature."""

    def kernel(*refs):
        if has_mask:
            q_ref, k_ref, v_ref, mask_ref, attn_ref, out_ref = refs
        else:
            q_ref, k_ref, v_ref, attn_ref, out_ref = refs
            mask_ref = None

        q = q_ref[...].astype(jnp.float32)          # (G, S, D)
        k = k_ref[...].astype(jnp.float32)          # (G, S, D)
        v = v_ref[...]                              # (G, S, D)

        # scores = q @ k^T / sqrt(D)  -- contract last dims, no transpose copy.
        scores = jnp.einsum(
            "gqd,gkd->gqk", q, k, preferred_element_type=jnp.float32) * scale

        if mask_ref is not None:
            scores = scores + mask_ref[...].astype(jnp.float32) * (-1e9)

        # Numerically-stable softmax along the key axis.
        m = jnp.max(scores, axis=-1, keepdims=True)
        e = jnp.exp(scores - m)                     # EUP
        denom = jnp.sum(e, axis=-1, keepdims=True)  # XLU reduce
        p = e * pl.reciprocal(denom)                # exact reciprocal

        attn_ref[...] = p.astype(attn_ref.dtype)
        out_ref[...] = jnp.einsum(
            "gqk,gkd->gqd", p.astype(v.dtype), v,
            preferred_element_type=jnp.float32).astype(out_ref.dtype)

    return kernel


def scaled_multi_head_attn(q, k, v, mask=None, *, bh_block=None):
    """
    q, k, v : f32[B, H, S, D]
    mask    : optional f32[B, H, S, S] (1.0 where masked, 0.0 where kept)
    returns : (attn_weights f32[B, H, S, S], outputs f32[B, H, S, D])
    """
    B, H, S, D = q.shape
    BH = B * H
    if bh_block is None:
        bh_block = min(BH, 8)          # several heads per grid step -> fewer
                                       # per-step pipeline overheads at tiny S/D
    scale = 1.0 / math.sqrt(D)

    q_z = q.reshape(BH, S, D)
    k_z = k.reshape(BH, S, D)
    v_z = v.reshape(BH, S, D)

    qkv_spec = pl.BlockSpec((bh_block, S, D), lambda i: (i, 0, 0))
    ss_spec = pl.BlockSpec((bh_block, S, S), lambda i: (i, 0, 0))

    in_specs = [qkv_spec, qkv_spec, qkv_spec]
    inputs = [q_z, k_z, v_z]
    has_mask = mask is not None
    if has_mask:
        in_specs.append(ss_spec)
        inputs.append(mask.reshape(BH, S, S).astype(q.dtype))

    out_shapes = (
        jax.ShapeDtypeStruct((BH, S, S), q.dtype),   # attn_weights
        jax.ShapeDtypeStruct((BH, S, D), q.dtype),   # outputs
    )
    out_specs = (ss_spec, qkv_spec)

    # Accurate (tiny) cost estimate so XLA can schedule/fuse around this call.
    itemsize = jnp.dtype(q.dtype).itemsize
    flops = 4 * BH * S * S * D                     # QK^T and P@V
    transcendentals = BH * S * S                   # exp
    bytes_accessed = itemsize * (
        3 * BH * S * D                             # q, k, v in
        + (BH * S * S if has_mask else 0)          # mask in
        + BH * S * S + BH * S * D)                 # attn, out

    attn_z, out_z = pl.pallas_call(
        _make_attn_kernel(has_mask, scale),
        out_shape=out_shapes,
        grid_spec=pltpu.PrefetchScalarGridSpec(
            num_scalar_prefetch=0,
            grid=(pl.cdiv(BH, bh_block),),
            in_specs=in_specs,
            out_specs=out_specs,
        ),
        compiler_params=pltpu.CompilerParams(
            dimension_semantics=("parallel",)),
        cost_estimate=pl.CostEstimate(
            flops=flops,
            transcendentals=transcendentals,
            bytes_accessed=bytes_accessed),
    )(*inputs)

    return attn_z.reshape(B, H, S, S), out_z.reshape(B, H, S, D)


if __name__ == "__main__":
    B, H, S, D = 2, 4, 8, 32

    key = jax.random.PRNGKey(0)
    kq, kk, kv, km = jax.random.split(key, 4)
    q = jax.random.normal(kq, (B, H, S, D), dtype=jnp.float32)
    k = jax.random.normal(kk, (B, H, S, D), dtype=jnp.float32)
    v = jax.random.normal(kv, (B, H, S, D), dtype=jnp.float32)
    # 0/1 additive-style mask (1.0 => position is masked out), like the spec.
    mask = (jax.random.uniform(km, (B, H, S, S)) > 0.7).astype(jnp.float32)

    # --- masked path ---
    attn_w, out = jax.block_until_ready(scaled_multi_head_attn(q, k, v, mask))

    scores_ref = jnp.einsum("bhqd,bhkd->bhqk", q, k) / math.sqrt(D)
    scores_ref = scores_ref + mask * (-1e9)
    attn_ref = jax.nn.softmax(scores_ref, axis=-1)
    out_ref = jnp.einsum("bhqk,bhkd->bhqd", attn_ref, v)

    assert attn_w.shape == (B, H, S, S) and out.shape == (B, H, S, D)
    assert jnp.allclose(attn_w, attn_ref, atol=1e-5, rtol=1e-5)
    assert jnp.allclose(out, out_ref, atol=1e-5, rtol=1e-5)

    # --- no-mask path ---
    attn_w2, out2 = jax.block_until_ready(scaled_multi_head_attn(q, k, v, None))

    scores2 = jnp.einsum("bhqd,bhkd->bhqk", q, k) / math.sqrt(D)
    attn_ref2 = jax.nn.softmax(scores2, axis=-1)
    out_ref2 = jnp.einsum("bhqk,bhkd->bhqd", attn_ref2, v)
    assert jnp.allclose(attn_w2, attn_ref2, atol=1e-5, rtol=1e-5)
    assert jnp.allclose(out2, out_ref2, atol=1e-5, rtol=1e-5)

    print("KERNEL_OK")
</pallas_src>

<mosaic_0001>
module attributes {stable_mosaic.version = 11 : i64} {
  func.func @kernel(%arg0: i32, %arg1: memref<8x8x32xf32, #tpu.memory_space<vmem>>, %arg2: memref<8x8x32xf32, #tpu.memory_space<vmem>>, %arg3: memref<8x8x32xf32, #tpu.memory_space<vmem>>, %arg4: memref<8x8x8xf32, #tpu.memory_space<vmem>>, %arg5: memref<8x8x8xf32, #tpu.memory_space<vmem>>, %arg6: memref<8x8x32xf32, #tpu.memory_space<vmem>>) attributes {dimension_semantics = [#tpu.dimension_semantics<parallel>], iteration_bounds = array<i64: 1>, scalar_prefetch = 0 : i64, scratch_operands = 0 : i64, tpu.core_type = #tpu.core_type<tc>, window_params = [{transform_indices = @transform_0, window_bounds = array<i64: 8, 8, 32>}, {transform_indices = @transform_1, window_bounds = array<i64: 8, 8, 32>}, {transform_indices = @transform_2, window_bounds = array<i64: 8, 8, 32>}, {transform_indices = @transform_3, window_bounds = array<i64: 8, 8, 8>}, {transform_indices = @transform_4, window_bounds = array<i64: 8, 8, 8>}, {transform_indices = @transform_5, window_bounds = array<i64: 8, 8, 32>}]} {
    %c0 = arith.constant 0 : index
    %c0_0 = arith.constant 0 : index
    %c0_1 = arith.constant 0 : index
    %0 = vector.load %arg1[%c0, %c0_0, %c0_1] : memref<8x8x32xf32, #tpu.memory_space<vmem>>, vector<8x8x32xf32>
    %c0_2 = arith.constant 0 : index
    %c0_3 = arith.constant 0 : index
    %c0_4 = arith.constant 0 : index
    %1 = vector.load %arg2[%c0_2, %c0_3, %c0_4] : memref<8x8x32xf32, #tpu.memory_space<vmem>>, vector<8x8x32xf32>
    %c0_5 = arith.constant 0 : index
    %c0_6 = arith.constant 0 : index
    %c0_7 = arith.constant 0 : index
    %2 = vector.load %arg3[%c0_5, %c0_6, %c0_7] : memref<8x8x32xf32, #tpu.memory_space<vmem>>, vector<8x8x32xf32>
    "tpu.trace_start"() <{level = 10 : i32, message = "gqd,gkd->gqk"}> : () -> ()
    %cst = arith.constant dense<0.000000e+00> : vector<8x8x8xf32>
    %3 = tpu.matmul %0, %1, %cst {dimension_numbers = #tpu.dot_dimension_numbers<[2], [2], [1], [1], [0, 0, 0, 1, 1, 1], [0], [0]>} : vector<8x8x32xf32>, vector<8x8x32xf32>, vector<8x8x8xf32> -> vector<8x8x8xf32>
    "tpu.trace_stop"() : () -> ()
    %cst_8 = arith.constant 0.176776692 : f32
    %4 = vector.broadcast %cst_8 : f32 to vector<8x8x8xf32>
    %5 = arith.mulf %3, %4 : vector<8x8x8xf32>
    %c0_9 = arith.constant 0 : index
    %c0_10 = arith.constant 0 : index
    %c0_11 = arith.constant 0 : index
    %6 = vector.load %arg4[%c0_9, %c0_10, %c0_11] : memref<8x8x8xf32, #tpu.memory_space<vmem>>, vector<8x8x8xf32>
    %cst_12 = arith.constant -1.000000e+09 : f32
    %7 = vector.broadcast %cst_12 : f32 to vector<8x8x8xf32>
    %8 = arith.mulf %6, %7 : vector<8x8x8xf32>
    %9 = arith.addf %5, %8 : vector<8x8x8xf32>
    %cst_13 = arith.constant dense<0xFF800000> : vector<8x8xf32>
    %10 = vector.multi_reduction <maximumf>, %9, %cst_13 [2] : vector<8x8x8xf32> to vector<8x8xf32>
    %11 = vector.shape_cast %10 : vector<8x8xf32> to vector<8x8x1xf32>
    %12 = vector.broadcast %11 : vector<8x8x1xf32> to vector<8x8x8xf32>
    %13 = arith.subf %9, %12 : vector<8x8x8xf32>
    %14 = math.exp %13 : vector<8x8x8xf32>
    %cst_14 = arith.constant dense<0.000000e+00> : vector<8x8xf32>
    %15 = vector.multi_reduction <add>, %14, %cst_14 [2] : vector<8x8x8xf32> to vector<8x8xf32>
    %16 = vector.shape_cast %15 : vector<8x8xf32> to vector<8x8x1xf32>
    %17 = tpu.reciprocal %16 : vector<8x8x1xf32> -> vector<8x8x1xf32>
    %18 = vector.broadcast %17 : vector<8x8x1xf32> to vector<8x8x8xf32>
    %19 = arith.mulf %14, %18 : vector<8x8x8xf32>
    %c0_15 = arith.constant 0 : index
    %c0_16 = arith.constant 0 : index
    %c0_17 = arith.constant 0 : index
    %20 = vector.load %arg5[%c0_15, %c0_16, %c0_17] : memref<8x8x8xf32, #tpu.memory_space<vmem>>, vector<8x8x8xf32>
    tpu.vector_store %arg5[%c0_15, %c0_16, %c0_17], %19 {strides = array<i32>} : memref<8x8x8xf32, #tpu.memory_space<vmem>>, vector<8x8x8xf32>,
    "tpu.trace_start"() <{level = 10 : i32, message = "gqk,gkd->gqd"}> : () -> ()
    %cst_18 = arith.constant dense<0.000000e+00> : vector<8x8x32xf32>
    %21 = tpu.matmul %19, %2, %cst_18 {dimension_numbers = #tpu.dot_dimension_numbers<[2], [1], [1], [2], [0, 0, 0, 1, 1, 2], [0], [0]>} : vector<8x8x8xf32>, vector<8x8x32xf32>, vector<8x8x32xf32> -> vector<8x8x32xf32>
    "tpu.trace_stop"() : () -> ()
    %c0_19 = arith.constant 0 : index
    %c0_20 = arith.constant 0 : index
    %c0_21 = arith.constant 0 : index
    %22 = vector.load %arg6[%c0_19, %c0_20, %c0_21] : memref<8x8x32xf32, #tpu.memory_space<vmem>>, vector<8x8x32xf32>
    tpu.vector_store %arg6[%c0_19, %c0_20, %c0_21], %21 {strides = array<i32>} : memref<8x8x32xf32, #tpu.memory_space<vmem>>, vector<8x8x32xf32>,
    return
  }
  func.func @transform_0(%arg0: i32) -> (i32, i32, i32) {
    %c0_i32 = arith.constant 0 : i32
    %c0_i32_0 = arith.constant 0 : i32
    %c0_i32_1 = arith.constant 0 : i32
    return %arg0, %c0_i32, %c0_i32_0 : i32, i32, i32
  }
  func.func @transform_1(%arg0: i32) -> (i32, i32, i32) {
    %c0_i32 = arith.constant 0 : i32
    %c0_i32_0 = arith.constant 0 : i32
    %c0_i32_1 = arith.constant 0 : i32
    return %arg0, %c0_i32, %c0_i32_0 : i32, i32, i32
  }
  func.func @transform_2(%arg0: i32) -> (i32, i32, i32) {
    %c0_i32 = arith.constant 0 : i32
    %c0_i32_0 = arith.constant 0 : i32
    %c0_i32_1 = arith.constant 0 : i32
    return %arg0, %c0_i32, %c0_i32_0 : i32, i32, i32
  }
  func.func @transform_3(%arg0: i32) -> (i32, i32, i32) {
    %c0_i32 = arith.constant 0 : i32
    %c0_i32_0 = arith.constant 0 : i32
    %c0_i32_1 = arith.constant 0 : i32
    return %arg0, %c0_i32, %c0_i32_0 : i32, i32, i32
  }
  func.func @transform_4(%arg0: i32) -> (i32, i32, i32) {
    %c0_i32 = arith.constant 0 : i32
    %c0_i32_0 = arith.constant 0 : i32
    %c0_i32_1 = arith.constant 0 : i32
    return %arg0, %c0_i32, %c0_i32_0 : i32, i32, i32
  }
  func.func @transform_5(%arg0: i32) -> (i32, i32, i32) {
    %c0_i32 = arith.constant 0 : i32
    %c0_i32_0 = arith.constant 0 : i32
    %c0_i32_1 = arith.constant 0 : i32
    return %arg0, %c0_i32, %c0_i32_0 : i32, i32, i32
  }
}

</mosaic_0001>

<bundles_post_ra>
// kernel: tpu_custom_call.1
= control target key start
LH: loop header
LB: loop body
LE: loop exit
PB: predicated region body
PF: predicated region fallthrough
CT: control target
= control target key end

     0   :  { %11 = vsyncpa [#allocation3], 0  ;;  %s2045_s0 = inlined_call_operand.hbm [shape: f32[8,8,32], index: 0, kind: input, shape index: {}]   ;;  %s2046_s1 = inlined_call_operand.hbm [shape: f32[8,8,32], index: 1, kind: input, shape index: {}]   ;;  %s2047_s2 = inlined_call_operand.hbm [shape: f32[8,8,32], index: 2, kind: input, shape index: {}]   ;;  %s2048_s3 = inlined_call_operand.hbm [shape: f32[8,8,8], index: 3, kind: input, shape index: {}]   ;;  %s2049_s4 = inlined_call_operand.hbm [shape: f32[8,8,8], index: 4, kind: output, shape index: {0}]   ;;  %s2050_s5 = inlined_call_operand.hbm [shape: f32[8,8,32], index: 5, kind: output, shape index: {1}]  }
   0x1   :  { %12 = vsyncpa [#allocation6], 0 }
   0x2   :  { %13 = vsyncpa [#allocation9], 0 }
   0x3   :  { %14 = vsyncpa [#allocation4], 0 }
   0x4   :  { %15 = vsyncpa [#allocation12], 0  ;;  %s1785_s18 = smov [#allocation5]   ;;  %s1786_s20 = smov [#allocation2]  }
   0x5   :  { %s33_s19 = sshll.u32 %s1785_s18, 4  ;;  %s21_s21 = sshll.u32 %s1786_s20, 4  ;;  %s34_s19 = int_to_ptr.vmem [resolvable:$true] %s33_s19  ;;  %s1825_s21 = int_to_ptr.vmem [resolvable:$true] %s21_s21 }
   0x6   :  { %s1643_s24 = scalar_lea.hbm %s2046_s1, 1024 }
   0x7   :  { %p1644_p0 = scmp.ne.s32.totalorder %s2046_s1, %s1643_s24  ;;  %p1647_p1 = scmp.lt.u32.totalorder %s1643_s24, %s2046_s1 }
   0x9   :  { %p1649_p2 = pnand %p1647_p1, %p1644_p0 }
   0xb   :  { %1652 = shalt.err (!%p1649_p2)
}
   0xc   :  { %s1653_s29 = scalar_lea.vmem %s34_s19, 1024  ;;  %p1658_p4 = scmp.lt.s32.totalorder %s34_s19, %s34_s19 }
   0xd   :  { %p1654_p3 = scmp.ne.s32.totalorder %s34_s19, %s1653_s29  ;;  %p1659_p5 = scmp.lt.s32.totalorder %s1653_s29, %s1653_s29 }
   0xf   :  { %p1660_p6 = por %p1659_p5, %p1658_p4 }
  0x11   :  { %p1661_p7 = pnand %p1660_p6, %p1654_p3 }
  0x13   :  { %1664 = shalt.err (!%p1661_p7)
}
  0x14   :  { %s1787_s30 = smov 128   ;;  %s1788_s6 = smov 8  }
  0x15   :  { %39 = dma.hbm_to_vmem [thread:$0]  %s2046_s1, 1024, %s34_s19, [#allocation6], %s1787_s30, %s1787_s30, %s1788_s6  }
  0x16   :  { %s1665_s11 = scalar_lea.hbm %s2045_s0, 1024 }
  0x17   :  { %p1666_p8 = scmp.ne.s32.totalorder %s2045_s0, %s1665_s11  ;;  %p1669_p9 = scmp.lt.u32.totalorder %s1665_s11, %s2045_s0 }
  0x19   :  { %p1671_p10 = pnand %p1669_p9, %p1666_p8 }
  0x1b   :  { %1674 = shalt.err (!%p1671_p10)
}
  0x1c   :  { %s1675_s16 = scalar_lea.vmem %s1825_s21, 1024  ;;  %p1680_p12 = scmp.lt.s32.totalorder %s1825_s21, %s1825_s21 }
  0x1d   :  { %p1676_p11 = scmp.ne.s32.totalorder %s1825_s21, %s1675_s16  ;;  %p1681_p13 = scmp.lt.s32.totalorder %s1675_s16, %s1675_s16 }
  0x1f   :  { %p1682_p0 = por %p1681_p13, %p1680_p12 }
  0x21   :  { %p1683_p1 = pnand %p1682_p0, %p1676_p11 }
  0x23   :  { %1686 = shalt.err (!%p1683_p1)
}
  0x24   :  { %27 = dma.hbm_to_vmem [thread:$0]  %s2045_s0, 1024, %s1825_s21, [#allocation3], %s1787_s30, %s1787_s30, %s1788_s6  }
  0x25   :  { %s1789_s18 = smov [#allocation7]   ;;  %s1790_s20 = smov [#allocation8]  }
  0x26   :  { %s45_s19 = sshll.u32 %s1789_s18, 4  ;;  %s57_s22 = sshll.u32 %s1790_s20, 4  ;;  %s46_s19 = int_to_ptr.vmem [resolvable:$true] %s45_s19  ;;  %s1862_s22 = int_to_ptr.vmem [resolvable:$true] %s57_s22 }
  0x27   :  { %s1687_s25 = scalar_lea.hbm %s2047_s2, 1024 }
  0x28   :  { %p1688_p2 = scmp.ne.s32.totalorder %s2047_s2, %s1687_s25  ;;  %p1691_p3 = scmp.lt.u32.totalorder %s1687_s25, %s2047_s2 }
  0x2a   :  { %p1693_p4 = pnand %p1691_p3, %p1688_p2 }
  0x2c   :  { %1696 = shalt.err (!%p1693_p4)
}
  0x2d   :  { %s1697_s0 = scalar_lea.vmem %s46_s19, 1024  ;;  %p1702_p6 = scmp.lt.s32.totalorder %s46_s19, %s46_s19 }
  0x2e   :  { %p1698_p5 = scmp.ne.s32.totalorder %s46_s19, %s1697_s0  ;;  %p1703_p7 = scmp.lt.s32.totalorder %s1697_s0, %s1697_s0 }
  0x30   :  { %p1704_p8 = por %p1703_p7, %p1702_p6 }
  0x32   :  { %p1705_p9 = pnand %p1704_p8, %p1698_p5 }
  0x34   :  { %1708 = shalt.err (!%p1705_p9)
}
  0x35   :  { %51 = dma.hbm_to_vmem [thread:$0]  %s2047_s2, 1024, %s46_s19, [#allocation6], %s1787_s30, %s1787_s30, %s1788_s6  }
  0x36   :  { %s1709_s10 = scalar_lea.hbm %s2048_s3, 1024 }
  0x37   :  { %p1710_p10 = scmp.ne.s32.totalorder %s2048_s3, %s1709_s10  ;;  %p1713_p11 = scmp.lt.u32.totalorder %s1709_s10, %s2048_s3 }
  0x39   :  { %p1715_p12 = pnand %p1713_p11, %p1710_p10 }
  0x3b   :  { %1718 = shalt.err (!%p1715_p12)
}
  0x3c   :  { %s1719_s15 = scalar_lea.vmem %s1862_s22, 1024  ;;  %p1724_p0 = scmp.lt.s32.totalorder %s1862_s22, %s1862_s22 }
  0x3d   :  { %p1720_p13 = scmp.ne.s32.totalorder %s1862_s22, %s1719_s15  ;;  %p1725_p1 = scmp.lt.s32.totalorder %s1719_s15, %s1719_s15 }
  0x3f   :  { %p1726_p2 = por %p1725_p1, %p1724_p0 }
  0x41   :  { %p1727_p3 = pnand %p1726_p2, %p1720_p13 }
  0x43   :  { %1730 = shalt.err (!%p1727_p3)
}
  0x44   :  { %63 = dma.hbm_to_vmem [thread:$0]  %s2048_s3, 1024, %s1862_s22, [#allocation9], %s1787_s30, %s1787_s30, %s1788_s6  }
  0x45   :  { %1775 = dma.done.wait [#allocation3], 1024  }
  0x46   :  { %1776 = vsyncadd [#allocation3], 4294966272 }
  0x47   :  { %1777 = dma.done.wait [#allocation6], 2048  }
  0x48   :  { %1778 = vsyncadd [#allocation6], 4294965248 }
  0x49   :  { %1779 = dma.done.wait [#allocation9], 1024  }
  0x4a   :  { %1780 = vsyncadd [#allocation9], 4294966272  ;;  %v1791_v0 = vmov 0.0   ;;  %vm1792_vm0 = vmmov 0   ;;  %vm100_vm1 = vcmask 261120   ;;  %v84_v1 = vld [vmem:[#allocation5] sm:$0xff] }
  0x4b   :  { %1521 = vmatprep.subr.mxu0 %v1791_v0  ;;  %1523 = vmatprep.mubr.msk.f32.mxu0 %vm1792_vm0, %v1791_v0  ;;  %v85_v2 = vld [vmem:[#allocation5 + $0x8] sm:$0xff]  ;;  %v76_v3 = vld [vmem:[#allocation2] sm:$0xff]  ;;  %v86_v5 = vld [vmem:[#allocation5 + $0x10] sm:$0xff]  ;;  %vm741_vm2 = vcmask 64512   ;;  %s1793_s3 = smov [#allocation10]  }
  0x4c   :  { %1526 = vmatprep.subr.mxu1 %v1791_v0  ;;  %1528 = vmatprep.mubr.msk.f32.mxu1 %vm1792_vm0, %v1791_v0  ;;  %v77_v4 = vld [vmem:[#allocation2 + $0x8] sm:$0xff]  ;;  %v87_v6 = vld [vmem:[#allocation5 + $0x18] sm:$0xff]  ;;  %v78_v7 = vld [vmem:[#allocation2 + $0x10] sm:$0xff]  ;;  %s1435_s1 = sshll.u32 %s1793_s3, 4  ;;  %s1436_s1 = int_to_ptr.vmem [resolvable:$true] %s1435_s1 }
  0x4d   :  { %1522 = vmatpush3.xpose.msk.msra.mxu0 %vm100_vm1, %v84_v1  ;;  %1527 = vmatpush3.xpose.msk.msra.mxu1 %vm100_vm1, %v85_v2  ;;  %v88_v8 = vld [vmem:[#allocation5 + $0x20] sm:$0xff]  ;;  %v79_v9 = vld [vmem:[#allocation2 + $0x18] sm:$0xff]  ;;  %v89_v10 = vld [vmem:[#allocation5 + $0x28] sm:$0xff]  ;;  %s1731_s17 = scalar_lea.vmem %s1436_s1, 1024  ;;  %p1736_p5 = scmp.lt.s32.totalorder %s1436_s1, %s1436_s1 }
  0x4e   :  { %1531 = vmatprep.subr.mxu0 %v1791_v0  ;;  %1536 = vmatprep.subr.mxu1 %v1791_v0  ;;  %v80_v11 = vld [vmem:[#allocation2 + $0x20] sm:$0xff]  ;;  %v90_v12 = vld [vmem:[#allocation5 + $0x30] sm:$0xff]  ;;  %v81_v13 = vld [vmem:[#allocation2 + $0x28] sm:$0xff]  ;;  %p1732_p4 = scmp.ne.s32.totalorder %s1436_s1, %s1731_s17  ;;  %p1737_p6 = scmp.lt.s32.totalorder %s1731_s17, %s1731_s17 }
  0x4f   :  { %v91_v14 = vld [vmem:[#allocation5 + $0x38] sm:$0xff]  ;;  %v82_v15 = vld [vmem:[#allocation2 + $0x30] sm:$0xff]  ;;  %v717_v17 = vld [vmem:[#allocation8] sm:$0xff] }
  0x50   :  { %1524 = vmatmul.mubr.msk.f32.vlgmr.msra.gmra.mrb[0].mxu0 %vm100_vm1, %v76_v3  ;;  %1529 = vmatmul.mubr.msk.f32.vlgmr.msra.gmra.mrb[0].mxu1 %vm100_vm1, %v77_v4  ;;  %v83_v16 = vld [vmem:[#allocation2 + $0x38] sm:$0xff]  ;;  %v718_v18 = vld [vmem:[#allocation8 + $0x8] sm:$0xff]  ;;  %v725_v19 = vmul.f32 -1e+09, %v717_v17  ;;  %v719_v23 = vld [vmem:[#allocation8 + $0x10] sm:$0xff]  ;;  %p1738_p7 = por %p1737_p6, %p1736_p5 }
  0x51   :  { %1532 = vmatpush3.xpose.msk.msra.mxu0 %vm100_vm1, %v86_v5  ;;  %1533 = vmatprep.mubr.msk.f32.mxu0 %vm1792_vm0, %v1791_v0  ;;  %v726_v20 = vmul.f32 -1e+09, %v718_v18  ;;  %v720_v28 = vld [vmem:[#allocation8 + $0x18] sm:$0xff]  ;;  %v727_v31 = vmul.f32 -1e+09, %v719_v23  ;;  %v721_v33 = vld [vmem:[#allocation8 + $0x20] sm:$0xff] }
  0x52   :  { %1541 = vmatprep.subr.mxu0 %v1791_v0  ;;  %1537 = vmatpush3.xpose.msk.msra.mxu1 %vm100_vm1, %v87_v6  ;;  %v728_v37 = vmul.f32 -1e+09, %v720_v28  ;;  %v722_v39 = vld [vmem:[#allocation8 + $0x28] sm:$0xff]  ;;  %v729_v44 = vmul.f32 -1e+09, %v721_v33  ;;  %v723_v46 = vld [vmem:[#allocation8 + $0x30] sm:$0xff]  ;;  %p1739_p8 = pnand %p1738_p7, %p1732_p4 }
  0x53   :  { %1538 = vmatprep.mubr.msk.f32.mxu1 %vm1792_vm0, %v1791_v0  ;;  %1546 = vmatprep.subr.mxu1 %v1791_v0  ;;  %v730_v51 = vmul.f32 -1e+09, %v722_v39  ;;  %v724_v53 = vld [vmem:[#allocation8 + $0x38] sm:$0xff]  ;;  %v731_v58 = vmul.f32 -1e+09, %v723_v46 }
  0x54   :  { %1534 = vmatmul.mubr.msk.f32.vlgmr.msra.gmra.mrb[2].mxu0 %vm100_vm1, %v78_v7  ;;  %v732_v1 = vmul.f32 -1e+09, %v724_v53 }
  0x55   :  { %1542 = vmatpush3.xpose.msk.msra.mxu0 %vm100_vm1, %v88_v8  ;;  %1543 = vmatprep.mubr.msk.f32.mxu0 %vm1792_vm0, %v1791_v0 }
  0x56   :  { %1539 = vmatmul.mubr.msk.f32.vlgmr.msra.gmra.mrb[2].mxu1 %vm100_vm1, %v79_v9  ;;  %1551 = vmatprep.subr.mxu0 %v1791_v0 }
  0x57   :  { %1547 = vmatpush3.xpose.msk.msra.mxu1 %vm100_vm1, %v89_v10  ;;  %1548 = vmatprep.mubr.msk.f32.mxu1 %vm1792_vm0, %v1791_v0 }
  0x58   :  { %1544 = vmatmul.mubr.msk.f32.vlgmr.msra.gmra.mrb[4].mxu0 %vm100_vm1, %v80_v11  ;;  %1556 = vmatprep.subr.mxu1 %v1791_v0 }
  0x59   :  { %1552 = vmatpush3.xpose.msk.msra.mxu0 %vm100_vm1, %v90_v12  ;;  %1553 = vmatprep.mubr.msk.f32.mxu0 %vm1792_vm0, %v1791_v0 }
  0x5a   :  { %1549 = vmatmul.mubr.msk.f32.vlgmr.msra.gmra.mrb[4].mxu1 %vm100_vm1, %v81_v13  ;;  %1561 = vmatprep.subr.mxu0 %v1791_v0 }
  0x5b   :  { %1557 = vmatpush3.xpose.msk.msra.mxu1 %vm100_vm1, %v91_v14  ;;  %1558 = vmatprep.mubr.msk.f32.mxu1 %vm1792_vm0, %v1791_v0 }
  0x5c   :  { %1554 = vmatmul.mubr.msk.f32.vlgmr.msra.gmra.mrb[6].mxu0 %vm100_vm1, %v82_v15  ;;  %1566 = vmatprep.subr.mxu1 %v1791_v0 }
  0x5d   :  { %1563 = vmatprep.mubr.msk.f32.mxu0 %vm1792_vm0, %v1791_v0 }
  0x5e   :  { %1559 = vmatmul.mubr.msk.f32.vlgmr.msra.gmra.mrb[6].mxu1 %vm100_vm1, %v83_v16 }
  0x5f   :  { %1568 = vmatprep.mubr.msk.f32.mxu1 %vm1792_vm0, %v1791_v0 }
 0x123   :  { %v173_v21 = vpop.f32.mrb[0].mxu0  ;;  %v249_v22 = vpop.f32.mrb[0].mxu1 }
 0x124   :  { %v709_v24 = vmul.f32 0.17677669, %v173_v21  ;;  %v1525_v25 = vpop.f32.mrb[1].mxu0  ;;  %v710_v26 = vmul.f32 0.17677669, %v249_v22  ;;  %v1530_v27 = vpop.f32.mrb[1].mxu1 }
 0x126   :  { %v733_v29 = vadd.f32 %v725_v19, %v709_v24  ;;  %v734_v30 = vadd.f32 %v726_v20, %v710_v26 }
 0x127   :  { %v325_v32 = vpop.f32.mrb[2].mxu0 }
 0x128   :  { %v711_v34 = vmul.f32 0.17677669, %v325_v32  ;;  %v1535_v35 = vpop.f32.mrb[3].mxu0  ;;  %v742_v36 = vsel %vm741_vm2, %v733_v29, -inf  ;;  %v745_v42 = vsel %vm741_vm2, %v734_v30, -inf }
 0x129   :  { %743 = vmax.xlane.f32.xlu0 %v742_v36  ;;  %v401_v38 = vpop.f32.mrb[2].mxu1 }
 0x12a   :  { %v712_v40 = vmul.f32 0.17677669, %v401_v38  ;;  %v1540_v41 = vpop.f32.mrb[3].mxu1  ;;  %v735_v43 = vadd.f32 %v727_v31, %v711_v34 }
 0x12b   :  { %v477_v45 = vpop.f32.mrb[4].mxu0 }
 0x12c   :  { %v713_v47 = vmul.f32 0.17677669, %v477_v45  ;;  %v748_v48 = vsel %vm741_vm2, %v735_v43, -inf  ;;  %v1545_v49 = vpop.f32.mrb[5].mxu0  ;;  %v736_v50 = vadd.f32 %v728_v37, %v712_v40 }
 0x12d   :  { %746 = vmax.xlane.f32.xlu0 %v745_v42  ;;  %749 = vmax.xlane.f32.xlu1 %v748_v48  ;;  %v553_v52 = vpop.f32.mrb[4].mxu1 }
 0x12e   :  { %v714_v54 = vmul.f32 0.17677669, %v553_v52  ;;  %v1550_v55 = vpop.f32.mrb[5].mxu1  ;;  %v751_v56 = vsel %vm741_vm2, %v736_v50, -inf  ;;  %v737_v57 = vadd.f32 %v729_v44, %v713_v47 }
 0x12f   :  { %v629_v59 = vpop.f32.mrb[6].mxu0 }
 0x130   :  { %v715_v60 = vmul.f32 0.17677669, %v629_v59  ;;  %v754_v61 = vsel %vm741_vm2, %v737_v57, -inf  ;;  %v1555_v62 = vpop.f32.mrb[7].mxu0  ;;  %v738_v63 = vadd.f32 %v730_v51, %v714_v54  ;;  %v93_v51 = vld [vmem:[#allocation7 + $0x8] sm:$0xff] }
 0x131   :  { %752 = vmax.xlane.f32.xlu1 %v751_v56  ;;  %755 = vmax.xlane.f32.xlu0 %v754_v61  ;;  %v705_v2 = vpop.f32.mrb[6].mxu1 }
 0x132   :  { %v716_v3 = vmul.f32 0.17677669, %v705_v2  ;;  %v1560_v4 = vpop.f32.mrb[7].mxu1  ;;  %v757_v5 = vsel %vm741_vm2, %v738_v63, -inf  ;;  %v739_v6 = vadd.f32 %v731_v58, %v715_v60  ;;  %1567 = vmatpush3.msra.mxu1 %v93_v51  ;;  %v94_v60 = vld [vmem:[#allocation7 + $0x10] sm:$0xff] }
 0x133   :  { %1576 = vmatprep.subr.mxu1 %v1791_v0 }
 0x134   :  { %v760_v7 = vsel %vm741_vm2, %v739_v6, -inf  ;;  %v740_v8 = vadd.f32 %v732_v1, %v716_v3  ;;  %v95_v3 = vld [vmem:[#allocation7 + $0x18] sm:$0xff] }
 0x135   :  { %758 = vmax.xlane.f32.xlu1 %v757_v5  ;;  %761 = vmax.xlane.f32.xlu0 %v760_v7  ;;  %v96_v5 = vld [vmem:[#allocation7 + $0x20] sm:$0xff] }
 0x136   :  { %v763_v9 = vsel %vm741_vm2, %v740_v8, -inf }
 0x139   :  { %764 = vmax.xlane.f32.xlu1 %v763_v9  ;;  %v97_v9 = vld [vmem:[#allocation7 + $0x28] sm:$0xff] }
 0x1b6   :  { %v744_v10 = vpop.xlane.xlu0 %743 }
 0x1b7   :  { %v766_v11 = vsub.f32 %v733_v29, %v744_v10 }
 0x1b9   :  { %v774_v12 = vmul.f32 1.442695, %v766_v11  ;;  %v98_v11 = vld [vmem:[#allocation7 + $0x30] sm:$0xff] }
 0x1ba   :  { %v747_v13 = vpop.xlane.xlu0 %746  ;;  %v750_v14 = vpop.xlane.xlu1 %749 }
 0x1bb   :  { %1611 = vpow2.f32 %v774_v12  ;;  %v767_v15 = vsub.f32 %v734_v30, %v747_v13  ;;  %v768_v16 = vsub.f32 %v735_v43, %v750_v14 }
 0x1bd   :  { %v776_v17 = vmul.f32 1.442695, %v767_v15  ;;  %v778_v18 = vmul.f32 1.442695, %v768_v16  ;;  %v99_v15 = vld [vmem:[#allocation7 + $0x38] sm:$0xff] }
 0x1be   :  { %v753_v19 = vpop.xlane.xlu1 %752  ;;  %v756_v20 = vpop.xlane.xlu0 %755 }
 0x1bf   :  { %1613 = vpow2.f32 %v776_v17  ;;  %v769_v21 = vsub.f32 %v736_v50, %v753_v19  ;;  %v770_v22 = vsub.f32 %v737_v57, %v756_v20  ;;  %v92_v50 = vld [vmem:[#allocation7] sm:$0xff] }
 0x1c0   :  { %1615 = vpow2.f32 %v778_v18  ;;  %1562 = vmatpush3.msra.mxu0 %v92_v50 }
 0x1c1   :  { %v780_v23 = vmul.f32 1.442695, %v769_v21  ;;  %v782_v24 = vmul.f32 1.442695, %v770_v22  ;;  %1571 = vmatprep.subr.mxu0 %v1791_v0 }
 0x1c2   :  { %v759_v25 = vpop.xlane.xlu1 %758  ;;  %v762_v26 = vpop.xlane.xlu0 %761 }
 0x1c3   :  { %1617 = vpow2.f32 %v780_v23  ;;  %v771_v27 = vsub.f32 %v738_v63, %v759_v25  ;;  %v772_v28 = vsub.f32 %v739_v6, %v762_v26 }
 0x1c4   :  { %1619 = vpow2.f32 %v782_v24 }
 0x1c5   :  { %v1612_v29 = vpop.eup %1611  ;;  %v784_v31 = vmul.f32 1.442695, %v771_v27  ;;  %v786_v30 = vmul.f32 1.442695, %v772_v28 }
 0x1c6   :  { %v765_v32 = vpop.xlane.xlu1 %764  ;;  %v790_v33 = vsel %vm741_vm2, %v1612_v29, 0.0 }
 0x1c7   :  { %1621 = vpow2.f32 %v784_v31  ;;  %v773_v34 = vsub.f32 %v740_v8, %v765_v32  ;;  %791 = vadd.xlane.f32.xlu0 %v790_v33 }
 0x1c8   :  { %1623 = vpow2.f32 %v786_v30 }
 0x1c9   :  { %v1614_v35 = vpop.eup %1613  ;;  %v788_v36 = vmul.f32 1.442695, %v773_v34 }
 0x1ca   :  { %v1616_v37 = vpop.eup %1615  ;;  %v793_v38 = vsel %vm741_vm2, %v1614_v35, 0.0 }
 0x1cb   :  { %1625 = vpow2.f32 %v788_v36  ;;  %794 = vadd.xlane.f32.xlu1 %v793_v38  ;;  %v796_v39 = vsel %vm741_vm2, %v1616_v37, 0.0 }
 0x1cc   :  { %797 = vadd.xlane.f32.xlu0 %v796_v39 }
 0x1cd   :  { %v1618_v40 = vpop.eup %1617 }
 0x1ce   :  { %v1620_v41 = vpop.eup %1619  ;;  %v799_v42 = vsel %vm741_vm2, %v1618_v40, 0.0 }
 0x1cf   :  { %800 = vadd.xlane.f32.xlu1 %v799_v42  ;;  %v802_v43 = vsel %vm741_vm2, %v1620_v41, 0.0 }
 0x1d0   :  { %803 = vadd.xlane.f32.xlu0 %v802_v43 }
 0x1d1   :  { %v1958_v44 = vpop.eup %1621 }
 0x1d2   :  { %v1960_v45 = vpop.eup %1623  ;;  %v805_v46 = vsel %vm741_vm2, %v1958_v44, 0.0 }
 0x1d3   :  { %806 = vadd.xlane.f32.xlu1 %v805_v46  ;;  %v808_v47 = vsel %vm741_vm2, %v1960_v45, 0.0 }
 0x1d4   :  { %809 = vadd.xlane.f32.xlu0 %v808_v47 }
 0x1d5   :  { %v1966_v48 = vpop.eup %1625 }
 0x1d6   :  { %v811_v49 = vsel %vm741_vm2, %v1966_v48, 0.0 }
 0x1d7   :  { %812 = vadd.xlane.f32.xlu1 %v811_v49 }
 0x254   :  { %v792_v52 = vpop.xlane.xlu0 %791 }
 0x255   :  { %1627 = vrcp.f32 %v792_v52 }
 0x258   :  { %v795_v53 = vpop.xlane.xlu1 %794 }
 0x259   :  { %1629 = vrcp.f32 %v795_v53  ;;  %v798_v54 = vpop.xlane.xlu0 %797 }
 0x25a   :  { %1631 = vrcp.f32 %v798_v54 }
 0x25c   :  { %v801_v55 = vpop.xlane.xlu1 %800 }
 0x25d   :  { %1633 = vrcp.f32 %v801_v55  ;;  %v804_v56 = vpop.xlane.xlu0 %803 }
 0x25e   :  { %1635 = vrcp.f32 %v804_v56 }
 0x25f   :  { %v1628_v57 = vpop.eup %1627 }
 0x260   :  { %v822_v58 = vmul.f32 %v1628_v57, %v1612_v29  ;;  %v807_v59 = vpop.xlane.xlu1 %806 }
 0x261   :  { %1637 = vrcp.f32 %v807_v59  ;;  %v810_v61 = vpop.xlane.xlu0 %809 }
 0x262   :  { %830 = vst.msk [vmem:[#allocation10] sm:$0xff] %vm741_vm2, %v822_v58  ;;  %1639 = vrcp.f32 %v810_v61  ;;  %1564 = vmatmul.mubr.msk.f32.vlgmr.msra.gmra.mrb[8].mxu0 %vm741_vm2, %v822_v58 }
 0x263   :  { %v1630_v62 = vpop.eup %1629  ;;  %1572 = vmatpush3.msra.mxu0 %v94_v60  ;;  %1573 = vmatprep.mubr.msk.f32.mxu0 %vm1792_vm0, %v1791_v0 }
 0x264   :  { %v1632_v63 = vpop.eup %1631  ;;  %v823_v1 = vmul.f32 %v1630_v62, %v1614_v35  ;;  %v813_v2 = vpop.xlane.xlu1 %812  ;;  %1581 = vmatprep.subr.mxu0 %v1791_v0 }
 0x265   :  { %v824_v4 = vmul.f32 %v1632_v63, %v1616_v37  ;;  %1641 = vrcp.f32 %v813_v2 }
 0x266   :  { %831 = vst.msk [vmem:[#allocation10 + $0x8] sm:$0xff] %vm741_vm2, %v823_v1  ;;  %1569 = vmatmul.mubr.msk.f32.vlgmr.msra.gmra.mrb[8].mxu1 %vm741_vm2, %v823_v1 }
 0x267   :  { %v1634_v6 = vpop.eup %1633  ;;  %832 = vst.msk [vmem:[#allocation10 + $0x10] sm:$0xff] %vm741_vm2, %v824_v4  ;;  %1574 = vmatmul.mubr.msk.f32.vlgmr.msra.gmra.mrb[10].mxu0 %vm741_vm2, %v824_v4  ;;  %1577 = vmatpush3.msra.mxu1 %v95_v3 }
 0x268   :  { %v1636_v7 = vpop.eup %1635  ;;  %v825_v8 = vmul.f32 %v1634_v6, %v1618_v40  ;;  %1578 = vmatprep.mubr.msk.f32.mxu1 %vm1792_vm0, %v1791_v0  ;;  %1582 = vmatpush3.msra.mxu0 %v96_v5 }
 0x269   :  { %v826_v10 = vmul.f32 %v1636_v7, %v1620_v41  ;;  %1583 = vmatprep.mubr.msk.f32.mxu0 %vm1792_vm0, %v1791_v0  ;;  %1586 = vmatprep.subr.mxu1 %v1791_v0 }
 0x26a   :  { %833 = vst.msk [vmem:[#allocation10 + $0x18] sm:$0xff] %vm741_vm2, %v825_v8  ;;  %1579 = vmatmul.mubr.msk.f32.vlgmr.msra.gmra.mrb[10].mxu1 %vm741_vm2, %v825_v8  ;;  %1591 = vmatprep.subr.mxu0 %v1791_v0 }
 0x26b   :  { %v1638_v12 = vpop.eup %1637  ;;  %834 = vst.msk [vmem:[#allocation10 + $0x20] sm:$0xff] %vm741_vm2, %v826_v10  ;;  %1584 = vmatmul.mubr.msk.f32.vlgmr.msra.gmra.mrb[12].mxu0 %vm741_vm2, %v826_v10  ;;  %1587 = vmatpush3.msra.mxu1 %v97_v9 }
 0x26c   :  { %v1640_v13 = vpop.eup %1639  ;;  %v827_v14 = vmul.f32 %v1638_v12, %v1958_v44  ;;  %1588 = vmatprep.mubr.msk.f32.mxu1 %vm1792_vm0, %v1791_v0  ;;  %1592 = vmatpush3.msra.mxu0 %v98_v11 }
 0x26d   :  { %v828_v16 = vmul.f32 %v1640_v13, %v1960_v45  ;;  %1593 = vmatprep.mubr.msk.f32.mxu0 %vm1792_vm0, %v1791_v0  ;;  %1596 = vmatprep.subr.mxu1 %v1791_v0 }
 0x26e   :  { %835 = vst.msk [vmem:[#allocation10 + $0x28] sm:$0xff] %vm741_vm2, %v827_v14  ;;  %1589 = vmatmul.mubr.msk.f32.vlgmr.msra.gmra.mrb[12].mxu1 %vm741_vm2, %v827_v14 }
 0x26f   :  { %v1642_v17 = vpop.eup %1641  ;;  %836 = vst.msk [vmem:[#allocation10 + $0x30] sm:$0xff] %vm741_vm2, %v828_v16  ;;  %1594 = vmatmul.mubr.msk.f32.vlgmr.msra.gmra.mrb[14].mxu0 %vm741_vm2, %v828_v16  ;;  %1597 = vmatpush3.msra.mxu1 %v99_v15 }
 0x270   :  { %v829_v18 = vmul.f32 %v1642_v17, %v1966_v48  ;;  %1598 = vmatprep.mubr.msk.f32.mxu1 %vm1792_vm0, %v1791_v0 }
 0x272   :  { %837 = vst.msk [vmem:[#allocation10 + $0x38] sm:$0xff] %vm741_vm2, %v829_v18  ;;  %1599 = vmatmul.mubr.msk.f32.vlgmr.msra.gmra.mrb[14].mxu1 %vm741_vm2, %v829_v18 }
 0x273   :  { %1742 = shalt.err (!%p1739_p8)
}
 0x274   :  { %s1743_s20 = scalar_lea.hbm %s2049_s4, 1024 }
 0x275   :  { %p1744_p9 = scmp.ne.s32.totalorder %s2049_s4, %s1743_s20  ;;  %p1747_p10 = scmp.lt.u32.totalorder %s1743_s20, %s2049_s4 }
 0x277   :  { %p1749_p11 = pnand %p1747_p10, %p1744_p9 }
 0x279   :  { %1752 = shalt.err (!%p1749_p11)
}
 0x27a   :  { %1441 = dma.vmem_to_hbm [thread:$0]  %s1436_s1, 1024, %s2049_s4, [#allocation4], %s1787_s30, %s1787_s30, %s1788_s6  }
 0x27b   :  { %s1794_s4 = smov [#allocation11]  }
 0x27c   :  { %s1447_s28 = sshll.u32 %s1794_s4, 4  ;;  %s1448_s28 = int_to_ptr.vmem [resolvable:$true] %s1447_s28 }
 0x27d   :  { %s1753_s29 = scalar_lea.vmem %s1448_s28, 1024  ;;  %p1758_p13 = scmp.lt.s32.totalorder %s1448_s28, %s1448_s28 }
 0x27e   :  { %p1754_p12 = scmp.ne.s32.totalorder %s1448_s28, %s1753_s29  ;;  %p1759_p0 = scmp.lt.s32.totalorder %s1753_s29, %s1753_s29 }
 0x280   :  { %p1760_p1 = por %p1759_p0, %p1758_p13 }
 0x282   :  { %p1761_p2 = pnand %p1760_p1, %p1754_p12 }
 0x335   :  { %v907_v0 = vpop.f32.mrb[8].mxu0 }
 0x336   :  { %1422 = vst.msk [vmem:[#allocation11] sm:$0xff] %vm100_vm1, %v907_v0  ;;  %v1565_v19 = vpop.f32.mrb[9].mxu0 }
 0x339   :  { %v980_v20 = vpop.f32.mrb[8].mxu1 }
 0x33a   :  { %1423 = vst.msk [vmem:[#allocation11 + $0x8] sm:$0xff] %vm100_vm1, %v980_v20  ;;  %v1053_v21 = vpop.f32.mrb[10].mxu0  ;;  %v1570_v22 = vpop.f32.mrb[9].mxu1 }
 0x33b   :  { %1424 = vst.msk [vmem:[#allocation11 + $0x10] sm:$0xff] %vm100_vm1, %v1053_v21  ;;  %v1575_v23 = vpop.f32.mrb[11].mxu0 }
 0x33d   :  { %v1126_v24 = vpop.f32.mrb[10].mxu1 }
 0x33e   :  { %1425 = vst.msk [vmem:[#allocation11 + $0x18] sm:$0xff] %vm100_vm1, %v1126_v24  ;;  %v1199_v25 = vpop.f32.mrb[12].mxu0  ;;  %v1580_v26 = vpop.f32.mrb[11].mxu1 }
 0x33f   :  { %1426 = vst.msk [vmem:[#allocation11 + $0x20] sm:$0xff] %vm100_vm1, %v1199_v25  ;;  %v1585_v27 = vpop.f32.mrb[13].mxu0 }
 0x341   :  { %v1272_v28 = vpop.f32.mrb[12].mxu1 }
 0x342   :  { %1427 = vst.msk [vmem:[#allocation11 + $0x28] sm:$0xff] %vm100_vm1, %v1272_v28  ;;  %v1345_v29 = vpop.f32.mrb[14].mxu0  ;;  %v1590_v31 = vpop.f32.mrb[13].mxu1 }
 0x343   :  { %1428 = vst.msk [vmem:[#allocation11 + $0x30] sm:$0xff] %vm100_vm1, %v1345_v29  ;;  %v1595_v30 = vpop.f32.mrb[15].mxu0 }
 0x345   :  { %v1418_v32 = vpop.f32.mrb[14].mxu1 }
 0x346   :  { %1429 = vst.msk [vmem:[#allocation11 + $0x38] sm:$0xff] %vm100_vm1, %v1418_v32  ;;  %v1600_v33 = vpop.f32.mrb[15].mxu1 }
 0x347   :  { %1764 = shalt.err (!%p1761_p2)
}
 0x348   :  { %s1765_s7 = scalar_lea.hbm %s2050_s5, 1024 }
 0x349   :  { %p1766_p3 = scmp.ne.s32.totalorder %s2050_s5, %s1765_s7  ;;  %p1769_p4 = scmp.lt.u32.totalorder %s1765_s7, %s2050_s5 }
 0x34b   :  { %p1771_p5 = pnand %p1769_p4, %p1766_p3 }
 0x34d   :  { %1774 = shalt.err (!%p1771_p5)
}
 0x34e   :  { %1453 = dma.vmem_to_hbm [thread:$0]  %s1448_s28, 1024, %s2050_s5, [#allocation12], %s1787_s30, %s1787_s30, %s1788_s6  }
 0x34f   :  { %1781 = dma.done.wait [#allocation4], 1024  }
 0x350   :  { %1782 = vsyncadd [#allocation4], 4294966272 }
 0x351   :  { %1783 = dma.done.wait [#allocation12], 1024  }
 0x352   :  { %1784 = vsyncadd [#allocation12], 4294966272 }
 0x353   :  { %1460 = vsyncpa [#allocation3], 1 }
 0x354   :  { %1461 = vsyncpa [#allocation6], 1 }
 0x355   :  { %1462 = vsyncpa [#allocation9], 1 }
 0x356   :  { %1463 = vsyncpa [#allocation4], 1 }
 0x357   :  { %1464 = vsyncpa [#allocation12], 1 }

</bundles_post_ra>
